<compile_context>
chip_gen: v6e
topology: v6e:2x2x1
jax: 0.10.0
libtpu: 0.0.40
codegen_flags: <defaults>
</compile_context>

<pallas_src>
import functools

import jax
import jax.numpy as jnp
from jax.experimental import pallas as pl
from jax.experimental.pallas import tpu as pltpu


# ---------------------------------------------------------------------------
# Kernels
# ---------------------------------------------------------------------------

def fms_fused_kernel(x_ref, wt_ref, b_ref, o_ref, *, inv_t):
    # x_ref: (1, C, T) input dtype; wt_ref: (C, C) f32 pre-transposed weight;
    # b_ref: (1, C) f32; o_ref: (1, C, T).
    xb = x_ref[...]                                             # no full upcast
    mean = jnp.sum(xb, axis=-1, dtype=jnp.float32) * inv_t      # (1, C) f32 accumulate
    z = jnp.dot(mean, wt_ref[...],
                preferred_element_type=jnp.float32) + b_ref[...]
    r = jax.nn.sigmoid(z)                                       # (1, C) f32, tiny
    r3 = r[:, :, None].astype(xb.dtype)                         # (1, C, 1) broadcast over lanes
    o_ref[...] = ((xb + 1) * r3).astype(o_ref.dtype)            # x*r + r == (x + 1) * r


def fms_reduce_kernel(x_ref, wt_ref, b_ref, r_ref, acc_ref, *, inv_t, t_total, t_tile):
    # Phase 1 of the tiled path: accumulate per-channel sums over T tiles,
    # compute r once per batch element at the last tile.
    t = pl.program_id(1)

    @pl.when(t == 0)
    def _():
        acc_ref[...] = jnp.zeros_like(acc_ref)

    xb = x_ref[...]                                             # (1, C, t_tile)
    if t_total % t_tile != 0:
        # Last tile runs past the end of x: mask the undefined lanes so they
        # do not pollute the sum (OOB lanes of the VMEM buffer hold stale data).
        lane = jax.lax.broadcasted_iota(jnp.int32, xb.shape, 2)
        valid = t_total - t * t_tile
        xb = jnp.where(lane < valid, xb, jnp.zeros_like(xb))
    acc_ref[...] += jnp.sum(xb, axis=-1, dtype=jnp.float32)     # (1, C)

    @pl.when(t == pl.num_programs(1) - 1)
    def _():
        mean = acc_ref[...] * inv_t                             # divide by the TRUE T
        z = jnp.dot(mean, wt_ref[...],
                    preferred_element_type=jnp.float32) + b_ref[...]
        r_ref[...] = jax.nn.sigmoid(z)[:, :, None]              # (1, C, 1)


def fms_scale_kernel(x_ref, r_ref, o_ref):
    # Phase 2 of the tiled path: pure vld/VPU/vst work per lane-dense tile.
    # OOB lanes of the last tile are computed on garbage but their stores are
    # discarded by Pallas (lanes are independent), so no mask is needed.
    xb = x_ref[...]                                             # (1, C, t_tile) input dtype
    r3 = r_ref[...].astype(xb.dtype)                            # (1, C, 1)
    o_ref[...] = ((xb + 1) * r3).astype(o_ref.dtype)


# ---------------------------------------------------------------------------
# Wrapper
# ---------------------------------------------------------------------------

_VMEM_LIMIT = 48 * 1024 * 1024  # safe on v5e/v6e (128 MiB) and v7x (64 MiB)


def fms_forward(x, weight, bias, *, max_block_bytes=8 * 1024 * 1024):
    """x: (B, C, T), weight: (C, C) (PyTorch Linear, out x in), bias: (C,) -> (B, C, T)."""
    B, C, T = x.shape
    w_t = jnp.asarray(weight).T.astype(jnp.float32)       # pre-transpose + cast once on host
    bias2d = jnp.asarray(bias).reshape(1, C).astype(jnp.float32)

    itemsize = jnp.dtype(x.dtype).itemsize
    block_bytes = C * T * itemsize
    inv_t = 1.0 / float(T)

    if block_bytes <= max_block_bytes:
        # Single-pass fused path: one read + one write of x, no padding copies.
        # Full-extent (C, T) block is legal even when T is not a multiple of 128.
        out = pl.pallas_call(
            functools.partial(fms_fused_kernel, inv_t=inv_t),
            out_shape=jax.ShapeDtypeStruct((B, C, T), x.dtype),
            grid_spec=pltpu.PrefetchScalarGridSpec(
                num_scalar_prefetch=0,
                grid=(B,),
                in_specs=[
                    pl.BlockSpec((1, C, T), lambda b: (b, 0, 0)),
                    pl.BlockSpec((C, C), lambda b: (0, 0)),
                    pl.BlockSpec((1, C), lambda b: (0, 0)),
                ],
                out_specs=pl.BlockSpec((1, C, T), lambda b: (b, 0, 0)),
            ),
            compiler_params=pltpu.CompilerParams(
                dimension_semantics=("parallel",),
                vmem_limit_bytes=_VMEM_LIMIT,
            ),
        )(x, w_t, bias2d)
        return out

    # Two-phase path for large T (accepts one extra read of x).
    t_tile = max(128, ((max_block_bytes // (C * itemsize)) // 128) * 128)
    t_tile = min(t_tile, ((T + 127) // 128) * 128)
    n_t = -(-T // t_tile)

    # Phase 1: r = sigmoid(mean_T(x) @ W^T + b), one (1, C, 1) row per batch.
    r_arr = pl.pallas_call(
        functools.partial(fms_reduce_kernel, inv_t=inv_t, t_total=T, t_tile=t_tile),
        out_shape=jax.ShapeDtypeStruct((B, C, 1), jnp.float32),
        grid_spec=pltpu.PrefetchScalarGridSpec(
            num_scalar_prefetch=0,
            grid=(B, n_t),
            in_specs=[
                pl.BlockSpec((1, C, t_tile), lambda b, t: (b, 0, t)),
                pl.BlockSpec((C, C), lambda b, t: (0, 0)),
                pl.BlockSpec((1, C), lambda b, t: (0, 0)),
            ],
            out_specs=pl.BlockSpec((1, C, 1), lambda b, t: (b, 0, 0)),
            scratch_shapes=[pltpu.VMEM((1, C), jnp.float32)],
        ),
        compiler_params=pltpu.CompilerParams(
            dimension_semantics=("parallel", "arbitrary"),
            vmem_limit_bytes=_VMEM_LIMIT,
        ),
    )(x, w_t, bias2d)

    # Phase 2: out = (x + 1) * r over lane-dense T tiles.
    out = pl.pallas_call(
        fms_scale_kernel,
        out_shape=jax.ShapeDtypeStruct((B, C, T), x.dtype),
        grid_spec=pltpu.PrefetchScalarGridSpec(
            num_scalar_prefetch=0,
            grid=(B, n_t),
            in_specs=[
                pl.BlockSpec((1, C, t_tile), lambda b, t: (b, 0, t)),
                pl.BlockSpec((1, C, 1), lambda b, t: (b, 0, 0)),
            ],
            out_specs=pl.BlockSpec((1, C, t_tile), lambda b, t: (b, 0, t)),
        ),
        compiler_params=pltpu.CompilerParams(
            dimension_semantics=("parallel", "parallel"),
            vmem_limit_bytes=_VMEM_LIMIT,
        ),
    )(x, r_arr)
    return out


def fms_reference(x, weight, bias):
    averaged = jnp.mean(x, axis=-1)
    r = jax.nn.sigmoid(averaged @ weight.T + bias)
    r = r[:, :, None]
    return x * r + r


# ---------------------------------------------------------------------------
# Test
# ---------------------------------------------------------------------------

if __name__ == "__main__":
    key = jax.random.PRNGKey(0)
    kx, kw, kb, kx2, kw2, kb2 = jax.random.split(key, 6)

    # Test 1: FMS(n_filters=4) on (B, C, T) = (2, 4, 16) — fused single-pass path
    # (T not a multiple of 128, exercises the full-extent unpadded block).
    B, C, T = 2, 4, 16
    x = jax.random.normal(kx, (B, C, T), dtype=jnp.float32)
    bound = 1.0 / float(C) ** 0.5
    weight = jax.random.uniform(kw, (C, C), minval=-bound, maxval=bound, dtype=jnp.float32)
    bias = jax.random.uniform(kb, (C,), minval=-bound, maxval=bound, dtype=jnp.float32)

    out = jax.block_until_ready(fms_forward(x, weight, bias))
    ref = fms_reference(x, weight, bias)
    assert out.shape == (B, C, T)
    assert jnp.allclose(out, ref, atol=1e-5, rtol=1e-5), "fused path mismatch vs reference"

    # Test 2: force tiny T tiles to exercise the two-phase (T-tiled) path with a
    # partial last tile (300 = 2*128 + 44) and the in-kernel OOB masking.
    B2, C2, T2 = 2, 8, 300
    x2 = jax.random.normal(kx2, (B2, C2, T2), dtype=jnp.float32)
    bound2 = 1.0 / float(C2) ** 0.5
    weight2 = jax.random.uniform(kw2, (C2, C2), minval=-bound2, maxval=bound2, dtype=jnp.float32)
    bias2 = jax.random.uniform(kb2, (C2,), minval=-bound2, maxval=bound2, dtype=jnp.float32)

    out2 = jax.block_until_ready(
        fms_forward(x2, weight2, bias2, max_block_bytes=C2 * 128 * 4))  # t_tile = 128 -> 3 tiles
    ref2 = fms_reference(x2, weight2, bias2)
    assert out2.shape == (B2, C2, T2)
    assert jnp.allclose(out2, ref2, atol=1e-5, rtol=1e-5), "tiled path mismatch vs reference"

    print("KERNEL_OK")
</pallas_src>

<mosaic_0001>
module attributes {stable_mosaic.version = 11 : i64} {
  func.func @fms_fused_kernel(%arg0: i32, %arg1: memref<1x4x16xf32, #tpu.memory_space<vmem>>, %arg2: memref<4x4xf32, #tpu.memory_space<vmem>>, %arg3: memref<1x4xf32, #tpu.memory_space<vmem>>, %arg4: memref<1x4x16xf32, #tpu.memory_space<vmem>>) attributes {dimension_semantics = [#tpu.dimension_semantics<parallel>], iteration_bounds = array<i64: 2>, scalar_prefetch = 0 : i64, scratch_operands = 0 : i64, tpu.core_type = #tpu.core_type<tc>, window_params = [{transform_indices = @transform_0, window_bounds = array<i64: 1, 4, 16>}, {pipeline_mode = #tpu.pipeline_mode<synchronous>, transform_indices = @transform_1, window_bounds = array<i64: 4, 4>}, {pipeline_mode = #tpu.pipeline_mode<synchronous>, transform_indices = @transform_2, window_bounds = array<i64: 1, 4>}, {transform_indices = @transform_3, window_bounds = array<i64: 1, 4, 16>}]} {
    %c0 = arith.constant 0 : index
    %c0_0 = arith.constant 0 : index
    %c0_1 = arith.constant 0 : index
    %0 = vector.load %arg1[%c0, %c0_0, %c0_1] : memref<1x4x16xf32, #tpu.memory_space<vmem>>, vector<1x4x16xf32>
    %cst = arith.constant dense<0.000000e+00> : vector<1x4xf32>
    %1 = vector.multi_reduction <add>, %0, %cst [2] : vector<1x4x16xf32> to vector<1x4xf32>
    %cst_2 = arith.constant 6.250000e-02 : f32
    %2 = vector.broadcast %cst_2 : f32 to vector<1x4xf32>
    %3 = arith.mulf %1, %2 : vector<1x4xf32>
    %c0_3 = arith.constant 0 : index
    %c0_4 = arith.constant 0 : index
    %4 = vector.load %arg2[%c0_3, %c0_4] : memref<4x4xf32, #tpu.memory_space<vmem>>, vector<4x4xf32>
    %cst_5 = arith.constant dense<0.000000e+00> : vector<1x4xf32>
    %5 = tpu.matmul %3, %4, %cst_5 {dimension_numbers = #tpu.dot_dimension_numbers<[1], [0], [0], [1], [0, 0, 1, 1], [], []>} : vector<1x4xf32>, vector<4x4xf32>, vector<1x4xf32> -> vector<1x4xf32>
    %c0_6 = arith.constant 0 : index
    %c0_7 = arith.constant 0 : index
    %6 = vector.load %arg3[%c0_6, %c0_7] : memref<1x4xf32, #tpu.memory_space<vmem>>, vector<1x4xf32>
    %7 = arith.addf %5, %6 : vector<1x4xf32>
    %8 = arith.negf %7 : vector<1x4xf32>
    %9 = math.exp %8 : vector<1x4xf32>
    %cst_8 = arith.constant 1.000000e+00 : f32
    %10 = vector.broadcast %cst_8 : f32 to vector<1x4xf32>
    %11 = arith.addf %10, %9 : vector<1x4xf32>
    %12 = arith.divf %10, %11 : vector<1x4xf32>
    %13 = vector.shape_cast %12 : vector<1x4xf32> to vector<1x4x1xf32>
    %cst_9 = arith.constant 1.000000e+00 : f32
    %14 = vector.broadcast %cst_9 : f32 to vector<1x4x16xf32>
    %15 = arith.addf %0, %14 : vector<1x4x16xf32>
    %16 = vector.broadcast %13 : vector<1x4x1xf32> to vector<1x4x16xf32>
    %17 = arith.mulf %15, %16 : vector<1x4x16xf32>
    %c0_10 = arith.constant 0 : index
    %c0_11 = arith.constant 0 : index
    %c0_12 = arith.constant 0 : index
    %18 = vector.load %arg4[%c0_10, %c0_11, %c0_12] : memref<1x4x16xf32, #tpu.memory_space<vmem>>, vector<1x4x16xf32>
    tpu.vector_store %arg4[%c0_10, %c0_11, %c0_12], %17 {strides = array<i32>} : memref<1x4x16xf32, #tpu.memory_space<vmem>>, vector<1x4x16xf32>,
    return
  }
  func.func @transform_0(%arg0: i32) -> (i32, i32, i32) {
    %c0_i32 = arith.constant 0 : i32
    %c0_i32_0 = arith.constant 0 : i32
    %c0_i32_1 = arith.constant 0 : i32
    return %arg0, %c0_i32, %c0_i32_0 : i32, i32, i32
  }
  func.func @transform_1(%arg0: i32) -> (i32, i32) {
    %c0_i32 = arith.constant 0 : i32
    %c0_i32_0 = arith.constant 0 : i32
    %c0_i32_1 = arith.constant 0 : i32
    return %c0_i32, %c0_i32_0 : i32, i32
  }
  func.func @transform_2(%arg0: i32) -> (i32, i32) {
    %c0_i32 = arith.constant 0 : i32
    %c0_i32_0 = arith.constant 0 : i32
    %c0_i32_1 = arith.constant 0 : i32
    return %c0_i32, %c0_i32_0 : i32, i32
  }
  func.func @transform_3(%arg0: i32) -> (i32, i32, i32) {
    %c0_i32 = arith.constant 0 : i32
    %c0_i32_0 = arith.constant 0 : i32
    %c0_i32_1 = arith.constant 0 : i32
    return %arg0, %c0_i32, %c0_i32_0 : i32, i32, i32
  }
}

</mosaic_0001>

<bundles_post_ra>
// kernel: tpu_custom_call.1
= control target key start
LH: loop header
LB: loop body
LE: loop exit
PB: predicated region body
PF: predicated region fallthrough
CT: control target
= control target key end

     0   :  { %8 = vsyncpa [#allocation3], 0  ;;  %s812_s0 = inlined_call_operand.hbm [shape: f32[2,4,16], index: 0, kind: input, shape index: {}]   ;;  %s813_s1 = inlined_call_operand.hbm [shape: f32[4,4], index: 1, kind: input, shape index: {}]   ;;  %s814_s2 = inlined_call_operand.vmem [shape: f32[1,4], index: 2, kind: input, shape index: {}]   ;;  %s815_s3 = inlined_call_operand.hbm [shape: f32[2,4,16], index: 3, kind: output, shape index: {}]  }
   0x1   :  { %10 = vsyncpa [#allocation3 + $0x1], 0 }
   0x2   :  { %11 = vsyncpa [#allocation6], 0 }
   0x3   :  { %12 = vsyncpa [#allocation4], 0 }
   0x4   :  { %14 = vsyncpa [#allocation4 + $0x1], 0  ;;  %s637_s12 = smov 0   ;;  %s639_s13 = smov 0  }
   0x5   :  { %s641_s14 = smov 0   ;;  %s643_s15 = smov 0  }
   0x6 LB: > { %s658_s16 = sadd.s32 4294967295, %s610_s15   ;;  %s401_s17 = sadd.s32 4294967294, %s610_s15   ;;  %s610_s15 = sphi %s643_s15, %s838_s15   ;;  %s606_s14 = sphi %s641_s14, %s837_s14   ;;  %s602_s13 = sphi %s639_s13, %s836_s13   ;;  %s598_s12 = sphi %s637_s12, %s835_s12  }
   0x7   : > { %p40_p0 = scmp.ne.s32.totalorder %s602_s13, %s598_s12  ;;  %p816_p1 = scmp.eq.s32.totalorder %s658_s16, 0 }
   0x8   : > { %p112_p3 = scmp.eq.s32.totalorder %s401_s17, 1  ;;  %p402_p5 = scmp.ge.s32.totalorder %s610_s15, 1 }
   0x9   : > { %p667_p4 = por %p816_p1, %p40_p0  ;;  %p119_p7 = scmp.lt.s32.totalorder %s610_s15, 3 }
   0xa   : > { %p672_p6 = por %p112_p3, %p40_p0  ;;  %s612_s21 = smov [#allocation5]  }
   0xb   : > { %s820_s18 = scalar_select %p667_p4, 1, 0 }
   0xc   : > { %s821_s19 = scalar_select %p672_p6, 1, 0 }
   0xd   : > { %p677_p8 = pnand %p402_p5, %p119_p7  ;;  %s132_s22 = sshll.u32 %s612_s21, 4  ;;  %s133_s22 = int_to_ptr.vmem [resolvable:$true] %s132_s22 }
   0xe   : > { %s685_s23 = sadd.s32 1, %s610_s15   ;;  %s27_s27 = sadd.s32 1, %s606_s14 }
   0xf   : > { %s822_s20 = scalar_select %p677_p8, 1, 0 }
  0x10   : > { %p433_p10 = pneg %p677_p8  ;;  %s24_s25 = ssub.s32 %s610_s15, %s685_s23 }
  0x11   : > { %p695_p12 = scmp.eq.s32.totalorder %s24_s25, 0  ;;  %p34_p13 = scmp.ne.s32.totalorder %s606_s14, %s602_s13 }
  0x12   : > { %p689_p11 = pnand %p433_p10, %p816_p1  ;;  %s499_s28 = scalar_lea.vmem %s133_s22, 64 }
  0x13   : > { %p500_p3 = scmp.ne.s32.totalorder %s133_s22, %s499_s28  ;;  %p507_p9 = scmp.lt.s32.totalorder %s133_s22, %s133_s22 }
  0x14   : > { %p490_p0 = pneg %p689_p11  ;;  %p508_p2 = scmp.lt.s32.totalorder %s499_s28, %s499_s28 }
  0x16   : > { %p502_p5 = pnand %p500_p3, %p490_p0  ;;  %p509_p10 = por %p508_p2, %p507_p9 }
  0x18   : > { %p503_p7 = pneg %p502_p5 }
  0x1a   : > { %p510_p1 = pnand %p509_p10, %p503_p7 }
  0x1c   : > { %513 = shalt.err (!%p510_p1)
}
  0x1d   : > { %436 = dma.hbm_to_vmem [thread:$0]  (!%p689_p11), %s813_s1, 64, %s133_s22, [#allocation6]  }
  0x1e   : > { %s712_s4 = scalar_select %p695_p12, %s606_s14, %s27_s27  }
  0x1f   : > { %p35_p1 = scmp.eq.s32.totalorder %s610_s15, 0  ;;  %p825_p2 = scmp.eq.s32.totalorder %s658_s16, 1 }
  0x20   : > { %p446_p0 = scmp.lt.s32.totalorder %s610_s15, 2  ;;  %s146_s6 = sand.u32 1, %s606_s14  }
  0x21   : > { %p720_p9 = por %p825_p2, %p34_p13  ;;  %p36_p3 = por %p35_p1, %p34_p13 }
  0x22   : > { %s405_s7 = sshll.u32 %s146_s6, 2  ;;  %s406_s8 = sshll.u32 %s610_s15, 6 }
  0x23   : > { %s826_s5 = scalar_select %p720_p9, 1, 0 }
  0x24   : > { %s733_s11 = scalar_lea.hbm %s812_s0, %s406_s8  ;;  %s150_s17 = scalar_lea.vmem [#allocation2], %s405_s7 }
  0x25   : > { %s157_s21 = sshll.u32 %s150_s17, 4  ;;  %p735_p11 = pnand %p446_p0, %p36_p3  ;;  %s158_s21 = int_to_ptr.vmem [resolvable:$true] %s157_s21 }
  0x26   : > { %s147_s24 = scalar_lea.sflag [#allocation3], %s146_s6  ;;  %s514_s25 = scalar_lea.hbm %s733_s11, 64 }
  0x27   : > { %p515_p12 = scmp.ne.s32.totalorder %s733_s11, %s514_s25  ;;  %p516_p13 = pneg %p735_p11 }
  0x28   : > { %s519_s28 = scalar_lea.hbm %s812_s0, 128  ;;  %p520_p10 = scmp.lt.s32.totalorder %s733_s11, %s812_s0 }
  0x29   : > { %p517_p5 = pnand %p516_p13, %p515_p12  ;;  %p521_p1 = scmp.lt.s32.totalorder %s519_s28, %s514_s25 }
  0x2b   : > { %p518_p7 = pneg %p517_p5  ;;  %p522_p2 = por %p521_p1, %p520_p10 }
  0x2d   : > { %p523_p0 = pnand %p522_p2, %p518_p7 }
  0x2f   : > { %526 = shalt.err (!%p523_p0)
}
  0x30   : > { %s527_s7 = scalar_lea.vmem %s158_s21, 64  ;;  %s613_s6 = smov [#allocation2]  }
  0x31   : > { %p528_p3 = scmp.ne.s32.totalorder %s158_s21, %s527_s7  ;;  %s532_s8 = sshll.u32 %s613_s6, 4  ;;  %s533_s8 = int_to_ptr.vmem [resolvable:$false] %s532_s8 }
  0x32   : > { %s534_s9 = scalar_lea.vmem %s533_s8, 128  ;;  %p535_p12 = scmp.lt.s32.totalorder %s158_s21, %s533_s8 }
  0x33   : > { %p530_p6 = pnand %p528_p3, %p516_p13  ;;  %p536_p5 = scmp.lt.s32.totalorder %s534_s9, %s527_s7 }
  0x35   : > { %p531_p9 = pneg %p530_p6  ;;  %p537_p4 = por %p536_p5, %p535_p12 }
  0x37   : > { %p538_p8 = pnand %p537_p4, %p531_p9 }
  0x39   : > { %541 = shalt.err (!%p538_p8)
}
  0x3a   : > { %440 = dma.hbm_to_vmem [thread:$0]  (!%p735_p11), %s733_s11, 64, %s158_s21, %s147_s24  }
  0x3b   : > { %p828_p7 = scmp.ne.s32.totalorder %s822_s20, 0 }
  0x3c   : > { %s756_s10 = sand.u32 (!%p828_p7), 1, %s602_s13   ;;  %p829_p4 = scmp.ne.s32.totalorder (!%p828_p7), %s820_s18, 0 }
  0x3d   : > { %166 = sbr.rel (%p828_p7) target bundleno = 573 (0x23d), region = 32  ;;  %s408_s17 = sshll.u32 (!%p828_p7), %s756_s10, 2 }
  0x3e   : > { %s169_s25 = scalar_lea.sflag (!%p828_p7), [#allocation3], %s756_s10  ;;  %s172_s26 = scalar_lea.vmem (!%p828_p7), [#allocation2], %s408_s17 }
  0x42   : > { %585 = dma.done.wait (%p829_p4), %s169_s25, 64  }
  0x43   : > { %587 = vsyncadd (%p829_p4), %s169_s25, 4294967232  ;;  %p830_p6 = scmp.eq.s32.totalorder %s658_s16, 0 }
  0x45   : > { %589 = dma.done.wait (%p830_p6), [#allocation6], 64   ;;  %p831_p8 = pmov %p830_p6 }
  0x46   : > { %vm200_vm0 = vcmask 125952   ;;  %v199_v0 = vld [vmem:[%s172_s26] sm:$0xf]  ;;  %v614_v2 = vmov 0.0   ;;  %v205_v3 = vld [vmem:[#allocation5] sm:$0xf]  ;;  %v208_v4 = vlaneseq }
  0x47   : > { %591 = vsyncadd (%p831_p8), [#allocation6], 4294967232  ;;  %v201_v1 = vsel %vm200_vm0, %v199_v0, 0.0  ;;  %420 = vmatprep.subr.mxu0 %v614_v2  ;;  %vm217_vm1 = vcmask 1043456   ;;  %vm615_vm2 = vmmov 0   ;;  %vm214_vm3 = vcmask 31744  }
  0x48   : > { %202 = vadd.xlane.f32.xlu0 %v201_v1  ;;  %421 = vmatpush3.msk.msra.mxu0 %vm217_vm1, %v205_v3  ;;  %v209_v5 = vand.u32 127, %v208_v4  ;;  %v211_v6 = vshrl.u32 %v208_v4, 7  ;;  %v206_v11 = vld [vmem:[%s814_s2] sm:$0x1]  ;;  %v304_v21 = vadd.f32 1.0, %v199_v0  ;;  %s415_s11 = sshll.u32 %s658_s16, 6 }
  0x49   : > { %422 = vmatprep.mubr.msk.f32.mxu0 %vm615_vm2, %v614_v2  ;;  %s198_s21 = scalar_lea.vmem [#allocation7], %s408_s17  ;;  %s319_s28 = scalar_lea.hbm %s815_s3, %s415_s11 }
  0x4a   : > { %v212_v7 = vsub.s32 %v209_v5, %v211_v6  ;;  %v299_v18 = vsub.s32 0, %v211_v6  ;;  %s321_s22 = sshll.u32 %s198_s21, 4  ;;  %s308_s29 = scalar_lea.sflag [#allocation4], %s756_s10  ;;  %s322_s22 = int_to_ptr.vmem [resolvable:$true] %s321_s22 }
  0x4b   : > { %s542_s30 = scalar_lea.vmem %s322_s22, 64  ;;  %p832_p11 = scmp.ne.s32.totalorder %s826_s5, 0 }
  0x4c   : > { %p543_p9 = scmp.ne.s32.totalorder %s322_s22, %s542_s30  ;;  %s616_s7 = smov [#allocation7]  }
  0x4d   : > { %s546_s16 = sshll.u32 %s616_s7, 4  ;;  %s547_s16 = int_to_ptr.vmem [resolvable:$false] %s546_s16 }
  0x4e   : > { %p544_p13 = pnand %p543_p9, %p832_p11  ;;  %s548_s6 = scalar_lea.vmem %s547_s16, 128 }
  0x4f   : > { %p549_p1 = scmp.lt.s32.totalorder %s322_s22, %s547_s16  ;;  %p550_p2 = scmp.lt.s32.totalorder %s548_s6, %s542_s30 }
  0x50   : > { %p545_p10 = pneg %p544_p13 }
  0x51   : > { %p551_p0 = por %p550_p2, %p549_p1 }
  0x53   : > { %p552_p3 = pnand %p551_p0, %p545_p10 }
  0xd1   : > { %v203_v8 = vpop.xlane.xlu0 %202 }
  0xd2   : > { %v204_v9 = vmul.f32 0.0625, %v203_v8 }
  0xd4   : > { %v213_v10 = vrot.slane %v204_v9, %v212_v7 }
  0xd6   : > { %423 = vmatmul.mubr.msk.f32.vlgmr.msra.gmra.mxu0 %vm214_vm3, %v213_v10 }
 0x196   : > { %v287_v12 = vpop.f32.mrf.mxu0 }
 0x197   : > { %v288_v13 = vadd.f32 %v287_v12, %v206_v11 }
 0x198   : > { %v424_v14 = vpop.f32.mrf.mxu0 }
 0x199   : > { %v413_v15 = vmul.f32 -1.442695, %v288_v13 }
 0x19b   : > { %484 = vpow2.f32 %v413_v15 }
 0x1a8   : > { %v485_v16 = vpop.eup %484 }
 0x1a9   : > { %v294_v17 = vadd.f32 1.0, %v485_v16 }
 0x1ab   : > { %486 = vrcp.f32 %v294_v17 }
 0x1b8   : > { %v487_v19 = vpop.eup %486 }
 0x1b9   : > { %v300_v20 = vrot.slane %v487_v19, %v299_v18 }
 0x1bb   : > { %302 = vbcast.lane.b32.xlu0 %v300_v20, 256 }
 0x22d   : > { %v303_v22 = vpop.permute.xlu0 %302 }
 0x22e   : > { %v305_v23 = vmul.f32 %v304_v21, %v303_v22 }
 0x230   : > { %306 = vst.msk [vmem:[%s198_s21] sm:$0xf] %vm200_vm0, %v305_v23 }
 0x231   : > { %555 = shalt.err (!%p552_p3)
}
 0x232   : > { %s556_s8 = scalar_lea.hbm %s319_s28, 64  ;;  %s560_s17 = scalar_lea.hbm %s815_s3, 128 }
 0x233   : > { %p557_p12 = scmp.ne.s32.totalorder %s319_s28, %s556_s8  ;;  %p561_p4 = scmp.lt.s32.totalorder %s319_s28, %s815_s3 }
 0x234   : > { %p562_p6 = scmp.lt.s32.totalorder %s560_s17, %s556_s8 }
 0x235   : > { %p558_p5 = pnand %p557_p12, %p832_p11 }
 0x236   : > { %p563_p8 = por %p562_p6, %p561_p4 }
 0x237   : > { %p559_p7 = pneg %p558_p5 }
 0x239   : > { %p564_p9 = pnand %p563_p8, %p559_p7 }
 0x23b   : > { %567 = shalt.err (!%p564_p9)
}
 0x23c   : > { %431 = dma.vmem_to_hbm [thread:$0]  (%p832_p11), %s322_s22, 64, %s319_s28, %s308_s29  }
 0x23d PF: > { %s333_s18 = sand.u32 1, %s598_s12   ;;  %p833_p13 = scmp.ne.s32.totalorder %s821_s19, 0 }
 0x23e   : > { %p834_p10 = scmp.ge.s32.totalorder %s610_s15, 2  ;;  %s334_s20 = scalar_lea.sflag [#allocation4], %s333_s18 }
 0x240   : > { %p442_p1 = pnand %p834_p10, %p833_p13 }
 0x242   : > { %p443_p2 = pneg %p442_p1 }
 0x244   : > { %593 = dma.done.wait (%p443_p2), %s334_s20, 64  }
 0x245   : > { %595 = vsyncadd (%p443_p2), %s334_s20, 4294967232  ;;  %p17_p0 = scmp.ge.s32.totalorder %s685_s23, 4   ;;  %s835_s12 = smov %s602_s13 }
 0x246   : > { %s836_s13 = smov %s606_s14  ;;  %s837_s14 = smov %s712_s4 }
 0x247   : > { %s838_s15 = smov %s685_s23  ;;  %19 = sbr.rel (!%p17_p0) target bundleno = 6 (0x6), region = 81 }
 0x24c   :  { %339 = vsyncpa [#allocation3], 1 }
 0x24d   :  { %341 = vsyncpa [#allocation3 + $0x1], 1 }
 0x24e   :  { %342 = vsyncpa [#allocation6], 1 }
 0x24f   :  { %343 = vsyncpa [#allocation4], 1 }
 0x250   :  { %345 = vsyncpa [#allocation4 + $0x1], 1 }

</bundles_post_ra>
